<compile_context>
chip_gen: v7x
topology: tpu7x:2x2x1
jax: 0.10.0
libtpu: 0.0.40
codegen_flags: <defaults>
</compile_context>

<pallas_src>
import jax
import jax.numpy as jnp
from jax.experimental import pallas as pl
from jax.experimental.pallas import tpu as pltpu


def attention_block_kernel(g_ref, x_ref, wg_ref, wx_ref, bsum_ref, wp_ref,
                           bp_ref, out_ref):
    # g_ref/x_ref: (C, T) — channels on sublanes, pixels on lanes.
    g = g_ref[...].astype(jnp.float32)
    x = x_ref[...].astype(jnp.float32)

    # 1x1 convs (BN folded): (F_int, Cin) @ (Cin, T) -> (F_int, T), lane-dense.
    g1 = jnp.dot(wg_ref[...], g, preferred_element_type=jnp.float32)
    x1 = jnp.dot(wx_ref[...], x, preferred_element_type=jnp.float32)

    # Single combined bias (bg + bx), broadcast over lanes, then ReLU.
    a = jnp.maximum(g1 + x1 + bsum_ref[...], 0.0)

    # psi conv in lane-dense orientation: (1, F_int) @ (F_int, T) -> (1, T).
    psi = jnp.dot(wp_ref[...], a, preferred_element_type=jnp.float32) + bp_ref[0, 0]
    psi = jax.nn.sigmoid(psi)

    # Gate x: broadcast psi over the channel (sublane) axis.
    out_ref[...] = (x * psi).astype(out_ref.dtype)


def fold_bn(w, b, gamma, beta, mean, var, eps=1e-5):
    """Fold eval-mode BatchNorm into a 1x1 conv.  w: (Cin, Cout), b: (Cout,)."""
    scale = gamma / jnp.sqrt(var + eps)
    w_f = w * scale[None, :]
    b_f = (b - mean) * scale + beta
    return w_f, b_f


def attention_block(g, x, params, *, tile_pixels=2048):
    """g, x: NCHW float32.  Returns x * psi in NCHW."""
    N, Cg, H, W = g.shape
    _, Cx, _, _ = x.shape
    F_int = params["wg"].shape[1]
    HW = H * W

    # Free reshapes (no transpose, no extra HBM traffic).
    g3 = g.reshape(N, Cg, HW)
    x3 = x.reshape(N, Cx, HW)

    # Fold BN into the 1x1 convs; transpose weights to (Cout, Cin) for the
    # lane-dense matmul orientation.
    wg, bg = fold_bn(params["wg"], params["bg"], params["gamma_g"],
                     params["beta_g"], params["mean_g"], params["var_g"])
    wx, bx = fold_bn(params["wx"], params["bx"], params["gamma_x"],
                     params["beta_x"], params["mean_x"], params["var_x"])
    wp, bp = fold_bn(params["wp"], params["bp"], params["gamma_p"],
                     params["beta_p"], params["mean_p"], params["var_p"])
    wgT = wg.T                                  # (F_int, Cg)
    wxT = wx.T                                  # (F_int, Cx)
    wpT = wp.T                                  # (1, F_int)
    b_sum = (bg + bx).reshape(F_int, 1)         # single bias add in-kernel
    bp = bp.reshape(1, 1)                       # scalar, lives in SMEM

    # Pixel tile: multiple of 128 lanes, capped at HW; ragged edge is handled
    # by Pallas masking, so no divisibility requirement on H*W.
    tile_pixels = max(128, (tile_pixels // 128) * 128)
    THW = tile_pixels if HW > tile_pixels else HW
    n_t = pl.cdiv(HW, THW)

    out3 = pl.pallas_call(
        attention_block_kernel,
        out_shape=jax.ShapeDtypeStruct((N, Cx, HW), x.dtype),
        grid_spec=pltpu.PrefetchScalarGridSpec(
            num_scalar_prefetch=0,
            grid=(N, n_t),
            in_specs=[
                pl.BlockSpec((None, Cg, THW), lambda n, t: (n, 0, t)),   # g tile
                pl.BlockSpec((None, Cx, THW), lambda n, t: (n, 0, t)),   # x tile
                pl.BlockSpec((F_int, Cg), lambda n, t: (0, 0)),          # Wg^T
                pl.BlockSpec((F_int, Cx), lambda n, t: (0, 0)),          # Wx^T
                pl.BlockSpec((F_int, 1), lambda n, t: (0, 0)),           # bg + bx
                pl.BlockSpec((1, F_int), lambda n, t: (0, 0)),           # Wpsi^T
                pl.BlockSpec(memory_space=pltpu.MemorySpace.SMEM),       # bpsi
            ],
            out_specs=pl.BlockSpec((None, Cx, THW), lambda n, t: (n, 0, t)),
        ),
        compiler_params=pltpu.CompilerParams(
            dimension_semantics=("parallel", "parallel"),
            vmem_limit_bytes=48 * 1024 * 1024),
    )(g3, x3, wgT, wxT, b_sum, wpT, bp)

    return out3.reshape(N, Cx, H, W)


def reference(g, x, params, eps=1e-5):
    """Pure-JAX reference (same math, eval-mode BN)."""
    def conv1x1_bn(inp, w, b, gamma, beta, mean, var):
        y = jnp.einsum("nchw,co->nohw", inp, w) + b[None, :, None, None]
        y = (y - mean[None, :, None, None]) / jnp.sqrt(var + eps)[None, :, None, None]
        return y * gamma[None, :, None, None] + beta[None, :, None, None]

    g1 = conv1x1_bn(g, params["wg"], params["bg"], params["gamma_g"],
                    params["beta_g"], params["mean_g"], params["var_g"])
    x1 = conv1x1_bn(x, params["wx"], params["bx"], params["gamma_x"],
                    params["beta_x"], params["mean_x"], params["var_x"])
    a = jnp.maximum(g1 + x1, 0.0)
    psi = conv1x1_bn(a, params["wp"], params["bp"], params["gamma_p"],
                     params["beta_p"], params["mean_p"], params["var_p"])
    psi = jax.nn.sigmoid(psi)
    return x * psi


def make_params(key, F_g, F_l, F_int):
    ks = jax.random.split(key, 9)
    # conv weights stored as (Cin, Cout); deterministic non-trivial BN stats.
    return {
        "wg": jax.random.normal(ks[0], (F_g, F_int), jnp.float32) * 0.2,
        "bg": jax.random.normal(ks[1], (F_int,), jnp.float32) * 0.1,
        "gamma_g": 1.0 + 0.1 * jax.random.normal(ks[2], (F_int,), jnp.float32),
        "beta_g": 0.05 * jnp.arange(F_int, dtype=jnp.float32),
        "mean_g": 0.02 * jnp.arange(F_int, dtype=jnp.float32),
        "var_g": 1.0 + 0.01 * jnp.arange(F_int, dtype=jnp.float32),
        "wx": jax.random.normal(ks[3], (F_l, F_int), jnp.float32) * 0.2,
        "bx": jax.random.normal(ks[4], (F_int,), jnp.float32) * 0.1,
        "gamma_x": 1.0 + 0.1 * jax.random.normal(ks[5], (F_int,), jnp.float32),
        "beta_x": -0.03 * jnp.arange(F_int, dtype=jnp.float32),
        "mean_x": 0.01 * jnp.arange(F_int, dtype=jnp.float32),
        "var_x": 1.0 + 0.02 * jnp.arange(F_int, dtype=jnp.float32),
        "wp": jax.random.normal(ks[6], (F_int, 1), jnp.float32) * 0.2,
        "bp": jax.random.normal(ks[7], (1,), jnp.float32) * 0.1,
        "gamma_p": jnp.array([1.1], jnp.float32),
        "beta_p": jnp.array([-0.05], jnp.float32),
        "mean_p": jnp.array([0.03], jnp.float32),
        "var_p": jnp.array([1.2], jnp.float32),
    }


if __name__ == "__main__":
    # Small shapes consistent with the module: F_g = F_l = 8, F_int = 32.
    N, F_g, F_l, F_int, H, W = 2, 8, 8, 32, 16, 16

    key = jax.random.PRNGKey(0)
    kg, kx, kp = jax.random.split(key, 3)
    g = jax.random.normal(kg, (N, F_g, H, W), jnp.float32)   # NCHW
    x = jax.random.normal(kx, (N, F_l, H, W), jnp.float32)   # NCHW
    params = make_params(kp, F_g, F_l, F_int)

    out = attention_block(g, x, params)
    out = jax.block_until_ready(out)

    ref = reference(g, x, params)
    assert out.shape == x.shape
    assert jnp.allclose(out, ref, atol=1e-4, rtol=1e-4), \
        f"max err {jnp.max(jnp.abs(out - ref))}"

    print("KERNEL_OK")
</pallas_src>

<mosaic_0001>
module attributes {stable_mosaic.version = 11 : i64} {
  func.func @attention_block_kernel(%arg0: i32, %arg1: i32, %arg2: memref<1x8x256xf32, #tpu.memory_space<vmem>>, %arg3: memref<1x8x256xf32, #tpu.memory_space<vmem>>, %arg4: memref<32x8xf32, #tpu.memory_space<vmem>>, %arg5: memref<32x8xf32, #tpu.memory_space<vmem>>, %arg6: memref<32x1xf32, #tpu.memory_space<vmem>>, %arg7: memref<1x32xf32, #tpu.memory_space<vmem>>, %arg8: memref<1x1xf32, #tpu.memory_space<smem>>, %arg9: memref<1x8x256xf32, #tpu.memory_space<vmem>>) attributes {dimension_semantics = [#tpu.dimension_semantics<parallel>, #tpu.dimension_semantics<parallel>], iteration_bounds = array<i64: 2, 1>, scalar_prefetch = 0 : i64, scratch_operands = 0 : i64, tpu.core_type = #tpu.core_type<tc>, window_params = [{transform_indices = @transform_0, window_bounds = array<i64: 1, 8, 256>}, {transform_indices = @transform_1, window_bounds = array<i64: 1, 8, 256>}, {pipeline_mode = #tpu.pipeline_mode<synchronous>, transform_indices = @transform_2, window_bounds = array<i64: 32, 8>}, {pipeline_mode = #tpu.pipeline_mode<synchronous>, transform_indices = @transform_3, window_bounds = array<i64: 32, 8>}, {pipeline_mode = #tpu.pipeline_mode<synchronous>, transform_indices = @transform_4, window_bounds = array<i64: 32, 1>}, {pipeline_mode = #tpu.pipeline_mode<synchronous>, transform_indices = @transform_5, window_bounds = array<i64: 1, 32>}, {transform_indices = @transform_6, window_bounds = array<i64: 1, 1>}, {transform_indices = @transform_7, window_bounds = array<i64: 1, 8, 256>}]} {
    %c0 = arith.constant 0 : index
    %c0_0 = arith.constant 0 : index
    %c0_1 = arith.constant 0 : index
    %0 = vector.load %arg2[%c0, %c0_0, %c0_1] : memref<1x8x256xf32, #tpu.memory_space<vmem>>, vector<1x8x256xf32>
    %1 = vector.shape_cast %0 : vector<1x8x256xf32> to vector<8x256xf32>
    %c0_2 = arith.constant 0 : index
    %c0_3 = arith.constant 0 : index
    %c0_4 = arith.constant 0 : index
    %2 = vector.load %arg3[%c0_2, %c0_3, %c0_4] : memref<1x8x256xf32, #tpu.memory_space<vmem>>, vector<1x8x256xf32>
    %3 = vector.shape_cast %2 : vector<1x8x256xf32> to vector<8x256xf32>
    %c0_5 = arith.constant 0 : index
    %c0_6 = arith.constant 0 : index
    %4 = vector.load %arg4[%c0_5, %c0_6] : memref<32x8xf32, #tpu.memory_space<vmem>>, vector<32x8xf32>
    %cst = arith.constant dense<0.000000e+00> : vector<32x256xf32>
    %5 = tpu.matmul %4, %1, %cst {dimension_numbers = #tpu.dot_dimension_numbers<[1], [0], [0], [1], [0, 0, 1, 1], [], []>} : vector<32x8xf32>, vector<8x256xf32>, vector<32x256xf32> -> vector<32x256xf32>
    %c0_7 = arith.constant 0 : index
    %c0_8 = arith.constant 0 : index
    %6 = vector.load %arg5[%c0_7, %c0_8] : memref<32x8xf32, #tpu.memory_space<vmem>>, vector<32x8xf32>
    %cst_9 = arith.constant dense<0.000000e+00> : vector<32x256xf32>
    %7 = tpu.matmul %6, %3, %cst_9 {dimension_numbers = #tpu.dot_dimension_numbers<[1], [0], [0], [1], [0, 0, 1, 1], [], []>} : vector<32x8xf32>, vector<8x256xf32>, vector<32x256xf32> -> vector<32x256xf32>
    %8 = arith.addf %5, %7 : vector<32x256xf32>
    %c0_10 = arith.constant 0 : index
    %c0_11 = arith.constant 0 : index
    %9 = vector.load %arg6[%c0_10, %c0_11] : memref<32x1xf32, #tpu.memory_space<vmem>>, vector<32x1xf32>
    %10 = vector.broadcast %9 : vector<32x1xf32> to vector<32x256xf32>
    %11 = arith.addf %8, %10 : vector<32x256xf32>
    %cst_12 = arith.constant 0.000000e+00 : f32
    %12 = vector.broadcast %cst_12 : f32 to vector<32x256xf32>
    %13 = arith.maximumf %11, %12 : vector<32x256xf32>
    %c0_13 = arith.constant 0 : index
    %c0_14 = arith.constant 0 : index
    %14 = vector.load %arg7[%c0_13, %c0_14] : memref<1x32xf32, #tpu.memory_space<vmem>>, vector<1x32xf32>
    %cst_15 = arith.constant dense<0.000000e+00> : vector<1x256xf32>
    %15 = tpu.matmul %14, %13, %cst_15 {dimension_numbers = #tpu.dot_dimension_numbers<[1], [0], [0], [1], [0, 0, 1, 1], [], []>} : vector<1x32xf32>, vector<32x256xf32>, vector<1x256xf32> -> vector<1x256xf32>
    %c0_16 = arith.constant 0 : index
    %c0_17 = arith.constant 0 : index
    %16 = memref.load %arg8[%c0_16, %c0_17] : memref<1x1xf32, #tpu.memory_space<smem>>
    %17 = vector.broadcast %16 : f32 to vector<1x256xf32>
    %18 = arith.addf %15, %17 : vector<1x256xf32>
    %19 = arith.negf %18 : vector<1x256xf32>
    %20 = math.exp %19 : vector<1x256xf32>
    %cst_18 = arith.constant 1.000000e+00 : f32
    %21 = vector.broadcast %cst_18 : f32 to vector<1x256xf32>
    %22 = arith.addf %21, %20 : vector<1x256xf32>
    %23 = arith.divf %21, %22 : vector<1x256xf32>
    %24 = vector.broadcast %23 : vector<1x256xf32> to vector<8x256xf32>
    %25 = arith.mulf %3, %24 : vector<8x256xf32>
    %c0_19 = arith.constant 0 : index
    %c0_20 = arith.constant 0 : index
    %c0_21 = arith.constant 0 : index
    %26 = vector.load %arg9[%c0_19, %c0_20, %c0_21] : memref<1x8x256xf32, #tpu.memory_space<vmem>>, vector<1x8x256xf32>
    %27 = vector.shape_cast %26 : vector<1x8x256xf32> to vector<8x256xf32>
    %28 = vector.shape_cast %25 : vector<8x256xf32> to vector<1x8x256xf32>
    tpu.vector_store %arg9[%c0_19, %c0_20, %c0_21], %28 {strides = array<i32>} : memref<1x8x256xf32, #tpu.memory_space<vmem>>, vector<1x8x256xf32>,
    return
  }
  func.func @transform_0(%arg0: i32, %arg1: i32) -> (i32, i32, i32) {
    %c0_i32 = arith.constant 0 : i32
    %c0_i32_0 = arith.constant 0 : i32
    return %arg0, %c0_i32, %arg1 : i32, i32, i32
  }
  func.func @transform_1(%arg0: i32, %arg1: i32) -> (i32, i32, i32) {
    %c0_i32 = arith.constant 0 : i32
    %c0_i32_0 = arith.constant 0 : i32
    return %arg0, %c0_i32, %arg1 : i32, i32, i32
  }
  func.func @transform_2(%arg0: i32, %arg1: i32) -> (i32, i32) {
    %c0_i32 = arith.constant 0 : i32
    %c0_i32_0 = arith.constant 0 : i32
    %c0_i32_1 = arith.constant 0 : i32
    return %c0_i32, %c0_i32_0 : i32, i32
  }
  func.func @transform_3(%arg0: i32, %arg1: i32) -> (i32, i32) {
    %c0_i32 = arith.constant 0 : i32
    %c0_i32_0 = arith.constant 0 : i32
    %c0_i32_1 = arith.constant 0 : i32
    return %c0_i32, %c0_i32_0 : i32, i32
  }
  func.func @transform_4(%arg0: i32, %arg1: i32) -> (i32, i32) {
    %c0_i32 = arith.constant 0 : i32
    %c0_i32_0 = arith.constant 0 : i32
    %c0_i32_1 = arith.constant 0 : i32
    return %c0_i32, %c0_i32_0 : i32, i32
  }
  func.func @transform_5(%arg0: i32, %arg1: i32) -> (i32, i32) {
    %c0_i32 = arith.constant 0 : i32
    %c0_i32_0 = arith.constant 0 : i32
    %c0_i32_1 = arith.constant 0 : i32
    return %c0_i32, %c0_i32_0 : i32, i32
  }
  func.func @transform_6(%arg0: i32, %arg1: i32) -> (i32, i32) {
    %c0_i32 = arith.constant 0 : i32
    %c0_i32_0 = arith.constant 0 : i32
    %c0_i32_1 = arith.constant 0 : i32
    return %c0_i32, %c0_i32_0 : i32, i32
  }
  func.func @transform_7(%arg0: i32, %arg1: i32) -> (i32, i32, i32) {
    %c0_i32 = arith.constant 0 : i32
    %c0_i32_0 = arith.constant 0 : i32
    return %arg0, %c0_i32, %arg1 : i32, i32, i32
  }
}

</mosaic_0001>

<bundles_post_ra>
// kernel: tpu_custom_call.1
= control target key start
LH: loop header
LB: loop body
LE: loop exit
PB: predicated region body
PF: predicated region fallthrough
CT: control target
= control target key end

     0   :  { %s1221_s0 = inlined_call_operand.vmem [shape: f32[2,8,256], index: 0, kind: input, shape index: {}]   ;;  %s1222_s1 = inlined_call_operand.vmem [shape: f32[2,8,256], index: 1, kind: input, shape index: {}]   ;;  %s1223_s2 = inlined_call_operand.vmem [shape: f32[32,8], index: 2, kind: input, shape index: {}]   ;;  %s1224_s3 = inlined_call_operand.vmem [shape: f32[32,8], index: 3, kind: input, shape index: {}]   ;;  %s1225_s4 = inlined_call_operand.vmem [shape: f32[32,1], index: 4, kind: input, shape index: {}]   ;;  %s1226_s5 = inlined_call_operand.vmem [shape: f32[1,32], index: 5, kind: input, shape index: {}]   ;;  %s1227_s6 = inlined_call_operand.<no memory space> [shape: f32[1,1], index: 6, kind: input, shape index: {}]   ;;  %s1228_s7 = inlined_call_operand.hbm [shape: f32[2,8,256], index: 7, kind: output, shape index: {}]  }
   0x1   :  { %12 = sst [smem:[#allocation2]] %s1227_s6 }
   0x2   :  { %13 = vsyncpa [#allocation4], 0 }
   0x3   :  { %15 = vsyncpa [#allocation4 + $0x1], 0  ;;  %s1051_s26 = smov 0   ;;  %s1053_s27 = smov 0  }
   0x4   :  { %s1055_s28 = smov 0   ;;  %s1057_s29 = smov 0  }
   0x5   :  { %s1059_s30 = smov 0   ;;  %s1061_s8 = smov 0  }
   0x6 LB: > { %s813_s6 = sadd.s32 4294967295, %s1003_s8   ;;  %s814_s9 = sadd.s32 4294967294, %s1003_s8   ;;  %s1003_s8 = sphi %s1061_s8, %s21_s8   ;;  %s999_s30 = sphi %s1059_s30, %s1235_s30   ;;  %s995_s29 = sphi %s1057_s29, %s1234_s29   ;;  %s991_s28 = sphi %s1055_s28, %s1233_s28   ;;  %s987_s27 = sphi %s1053_s27, %s1232_s27   ;;  %s983_s26 = sphi %s1051_s26, %s1231_s26  }
   0x7   : > { %s33_s10 = sadd.s32 1, %s999_s30  ;;  %s203_s11 = sadd.s32 1, %s991_s28 }
   0x8   : > { %p35_p0 = scmp.ge.s32.totalorder %s33_s10, 2  ;;  %p213_p1 = scmp.ne.s32.totalorder %s991_s28, %s987_s27 }
   0x9   : > { %p214_p2 = scmp.eq.s32.totalorder %s813_s6, 1  ;;  %p219_p3 = scmp.ne.s32.totalorder %s987_s27, %s983_s26 }
   0xa   : > { %s1237_s10 = smov (%p35_p0, %s33_s10), 0  ;;  %p220_p5 = scmp.eq.s32.totalorder %s814_s9, 1 }
   0xb   : > { %p1091_p4 = por %p214_p2, %p213_p1  ;;  %s198_s13 = ssub.s32 %s999_s30, %s1237_s10 }
   0xc   : > { %p817_p6 = scmp.ge.s32.totalorder %s1003_s8, 1  ;;  %p201_p7 = scmp.eq.s32.totalorder %s198_s13, 0 }
   0xd   : > { %p1098_p8 = por %p220_p5, %p219_p3  ;;  %p279_p9 = scmp.lt.s32.totalorder %s1003_s8, 3 }
   0xe   : > { %s1104_s15 = scalar_select %p201_p7, %s991_s28, %s203_s11  }
   0xf   : > { %p280_p10 = pnand %p817_p6, %p279_p9 }
  0x10   : > { %p325_p11 = scmp.lt.s32.totalorder (!%p280_p10), %s995_s29, 1  ;;  %v1005_v0 = vmov (!%p280_p10), 0.0   ;;  %v1006_v1 = vmov (!%p280_p10), 0   ;;  %v560_v2 = vld [vmem:[%s1225_s4] sm:$0xff] (!%p280_p10)  ;;  %v562_v3 = vld [vmem:[%s1225_s4 + $0x10] sm:$0xff] (!%p280_p10)  ;;  %vm357_vm0 = vcmask (!%p280_p10), 64512  }
  0x11   : > { %283 = sbr.rel (%p280_p10) target bundleno = 528 (0x210), region = 48  ;;  %434 = vmatprep.mubr.f32.mxu1 (!%p280_p10), %v1005_v0  ;;  %535 = vmatprep.mubr.f32.mxu0 (!%p280_p10), %v1005_v0  ;;  %v353_v4 = vld [vmem:[%s1224_s3] sm:$0xff] (!%p280_p10)  ;;  %v561_v10 = vld [vmem:[%s1225_s4 + $0x8] sm:$0xff] (!%p280_p10)  ;;  %v563_v11 = vld [vmem:[%s1225_s4 + $0x18] sm:$0xff] (!%p280_p10)  ;;  %vm603_vm1 = vcmask (!%p280_p10), 261120   ;;  %s601_s22 = sld [smem:[#allocation2]] (!%p280_p10) }
  0x12   : > { %915 = vset.pattern.permute.xlu0 (!%p280_p10), %v1006_v1  ;;  %916 = vset.pattern.permute.xlu1 (!%p280_p10), %v1006_v1  ;;  %v349_v5 = vld [vmem:[%s1223_s2] sm:$0xff] (!%p280_p10)  ;;  %v354_v12 = vld [vmem:[%s1224_s3 + $0x8] sm:$0xff] (!%p280_p10)  ;;  %v355_v14 = vld [vmem:[%s1224_s3 + $0x10] sm:$0xff] (!%p280_p10)  ;;  %s321_s23 = sand.u32 (!%p280_p10), 1, %s987_s27   ;;  %s841_s25 = sshll.u32 (!%p280_p10), %s995_s29, 8 }
  0x13   : > { %566 = vperm.xlu0 (!%p280_p10), %915, %v560_v2   ;;  %576 = vperm.xlu1 (!%p280_p10), %916, %v562_v3   ;;  %v350_v13 = vld [vmem:[%s1223_s2 + $0x8] sm:$0xff] (!%p280_p10)  ;;  %v351_v15 = vld [vmem:[%s1223_s2 + $0x10] sm:$0xff] (!%p280_p10)  ;;  %v356_v16 = vld [vmem:[%s1224_s3 + $0x18] sm:$0xff] (!%p280_p10)  ;;  %s1174_s17 = scalar_lea.hbm (!%p280_p10), %s1228_s7, %s841_s25 }
  0x14   : > { %v352_v17 = vld [vmem:[%s1223_s2 + $0x18] sm:$0xff] (!%p280_p10)  ;;  %v600_v2 = vld [vmem:[%s1226_s5] sm:$0x1] (!%p280_p10) }
  0x17   : > { %571 = vperm.xlu0 (!%p280_p10), %915, %v561_v10   ;;  %581 = vperm.xlu1 (!%p280_p10), %916, %v563_v11   ;;  %v602_v3 = vstv (!%p280_p10), %s601_s22 }
  0x18   : > { %s326_s16 = scalar_select %p325_p11, %s995_s29, 1 }
  0x19   : > { %s703_s29 = scalar_lea.sflag [#allocation4], %s321_s23 }
  0x1a   : > { %s839_s21 = sshll.u32 %s326_s16, 4  ;;  %s1007_s16 = smov [#allocation3]  }
  0x1b   : > { %s342_s24 = scalar_lea.vmem %s1222_s1, %s839_s21  ;;  %s332_s9 = scalar_lea.vmem %s1221_s0, %s839_s21 }
  0x1c   : > { %v1126_v6 = vld [vmem:[%s342_s24 + $0x8] sm:$0xff]  ;;  %v1128_v8 = vld [vmem:[%s342_s24] sm:$0xff]  ;;  %s818_s24 = sshll.u32 %s321_s23, 4  ;;  %s929_s19 = sshll.u32 %s1007_s16, 4  ;;  %s930_s19 = int_to_ptr.vmem [resolvable:$false] %s929_s19 }
  0x1d   : > { %v346_v7 = vld [vmem:[%s332_s9 + $0x8] sm:$0xff]  ;;  %370 = vmatprep.subr.mxu1 %v1126_v6  ;;  %v345_v9 = vld [vmem:[%s332_s9] sm:$0xff]  ;;  %s323_s6 = scalar_lea.vmem [#allocation3], %s818_s24  ;;  %s931_s20 = scalar_lea.vmem %s930_s19, 512 }
  0x1e   : > { %471 = vmatprep.subr.mxu0 %v346_v7  ;;  %371 = vmatpush1.msra.mxu1 %v1128_v8  ;;  %s719_s9 = sshll.u32 %s323_s6, 4  ;;  %s1176_s9 = int_to_ptr.vmem [resolvable:$true] %s719_s9 }
  0x1f   : > { %472 = vmatpush1.msra.mxu0 %v345_v9  ;;  %823 = vmatmul.mubr.msk.f32.vlgmr.msra.gmra.mrb[0].mxu1 %vm357_vm0, %v353_v4  ;;  %s925_s18 = scalar_lea.vmem %s1176_s9, 256  ;;  %p932_p1 = scmp.lt.s32.totalorder %s1176_s9, %s930_s19 }
  0x20   : > { %827 = vmatmul.mubr.msk.f32.vlgmr.msra.gmra.mrb[0].mxu0 %vm357_vm0, %v349_v5  ;;  %440 = vmatprep.mubr.f32.mxu1 %v1005_v0  ;;  %p926_p12 = scmp.ne.s32.totalorder %s1176_s9, %s925_s18  ;;  %p933_p2 = scmp.lt.s32.totalorder %s931_s20, %s925_s18 }
  0x21   : > { %541 = vmatprep.mubr.f32.mxu0 %v1005_v0 }
  0x22   : > { %p927_p13 = pnand %p926_p12, %p1091_p4  ;;  %p934_p3 = por %p933_p2, %p932_p1 }
  0x23   : > { %824 = vmatmul.mubr.msk.f32.gmra.mrb[2].mxu1 %vm357_vm0, %v354_v12 }
  0x24   : > { %828 = vmatmul.mubr.msk.f32.gmra.mrb[2].mxu0 %vm357_vm0, %v350_v13  ;;  %446 = vmatprep.mubr.f32.mxu1 %v1005_v0  ;;  %p928_p0 = pneg %p927_p13 }
  0x25   : > { %547 = vmatprep.mubr.f32.mxu0 %v1005_v0 }
  0x26   : > { %p935_p5 = pnand %p934_p3, %p928_p0 }
  0x27   : > { %825 = vmatmul.mubr.msk.f32.gmra.mrb[4].mxu1 %vm357_vm0, %v355_v14 }
  0x28   : > { %829 = vmatmul.mubr.msk.f32.gmra.mrb[4].mxu0 %vm357_vm0, %v351_v15  ;;  %452 = vmatprep.mubr.f32.mxu1 %v1005_v0 }
  0x29   : > { %553 = vmatprep.mubr.f32.mxu0 %v1005_v0 }
  0x2b   : > { %826 = vmatmul.mubr.msk.f32.gmra.mrb[6].mxu1 %vm357_vm0, %v356_v16  ;;  %v690_v16 = vlaneseq }
  0x2c   : > { %830 = vmatmul.mubr.msk.f32.gmra.mrb[6].mxu0 %vm357_vm0, %v352_v17  ;;  %671 = vmatprep.mubr.f32.mxu1 %v1005_v0 }
  0x2d   : > { %v691_v17 = vshrl.u32 %v690_v16, 7 }
  0x92   : > { %v567_v18 = vpop.permute.xlu0 %566  ;;  %v577_v35 = vpop.permute.xlu1 %576 }
  0x96   : > { %v572_v25 = vpop.permute.xlu0 %571  ;;  %v582_v56 = vpop.permute.xlu1 %581 }
  0xf2   : > { %v436_v19 = vpop.f32.mrb[0].mxu1 }
  0xf3   : > { %v537_v20 = vpop.f32.mrb[0].mxu0  ;;  %v438_v22 = vpop.f32.mrb[1].mxu1 }
  0xf4   : > { %v538_v21 = vadd.f32 %v537_v20, %v436_v19  ;;  %v539_v23 = vpop.f32.mrb[1].mxu0 }
  0xf5   : > { %v540_v24 = vadd.f32 %v539_v23, %v438_v22 }
  0xf6   : > { %v442_v26 = vpop.f32.mrb[2].mxu1  ;;  %v584_v28 = vadd.f32 %v567_v18, %v538_v21 }
  0xf7   : > { %v543_v27 = vpop.f32.mrb[2].mxu0  ;;  %v444_v30 = vpop.f32.mrb[3].mxu1  ;;  %v585_v32 = vadd.f32 %v567_v18, %v540_v24  ;;  %v692_v18 = vsub.s32 0, %v691_v17 }
  0xf8   : > { %v544_v29 = vadd.f32 %v543_v27, %v442_v26  ;;  %v545_v31 = vpop.f32.mrb[3].mxu0  ;;  %v592_v39 = vmax.f32 %v584_v28, 0.0 }
  0xf9   : > { %v546_v33 = vadd.f32 %v545_v31, %v444_v30  ;;  %v593_v44 = vmax.f32 %v585_v32, 0.0 }
  0xfa   : > { %v586_v34 = vadd.f32 %v572_v25, %v544_v29  ;;  %v448_v37 = vpop.f32.mrb[4].mxu1 }
  0xfb   : > { %v587_v36 = vadd.f32 %v572_v25, %v546_v33  ;;  %v549_v38 = vpop.f32.mrb[4].mxu0  ;;  %v450_v42 = vpop.f32.mrb[5].mxu1 }
  0xfc   : > { %v594_v40 = vmax.f32 %v586_v34, 0.0  ;;  %v550_v41 = vadd.f32 %v549_v38, %v448_v37  ;;  %v551_v43 = vpop.f32.mrb[5].mxu0 }
  0xfd   : > { %v595_v45 = vmax.f32 %v587_v36, 0.0  ;;  %v552_v46 = vadd.f32 %v551_v43, %v450_v42 }
  0xfe   : > { %v844_v47 = vpack.c.bf16 %v594_v40, %v592_v39  ;;  %v454_v48 = vpop.f32.mrb[6].mxu1  ;;  %v588_v51 = vadd.f32 %v577_v35, %v550_v41 }
  0xff   : > { %v555_v49 = vpop.f32.mrb[6].mxu0  ;;  %v842_v50 = vpack.c.bf16 %v595_v45, %v593_v44  ;;  %v456_v53 = vpop.f32.mrb[7].mxu1  ;;  %v589_v55 = vadd.f32 %v577_v35, %v552_v46 }
 0x100   : > { %v556_v52 = vadd.f32 %v555_v49, %v454_v48  ;;  %v557_v54 = vpop.f32.mrb[7].mxu0  ;;  %v596_v60 = vmax.f32 %v588_v51, 0.0 }
 0x101   : > { %v558_v57 = vadd.f32 %v557_v54, %v456_v53  ;;  %843 = vmatprep.subr.bf16.mxu1 %v842_v50  ;;  %v597_v62 = vmax.f32 %v589_v55, 0.0 }
 0x102   : > { %v590_v58 = vadd.f32 %v582_v56, %v556_v52  ;;  %845 = vmatpush1.bf16.msra.mxu1 %v844_v47 }
 0x103   : > { %v591_v59 = vadd.f32 %v582_v56, %v558_v57 }
 0x104   : > { %v598_v61 = vmax.f32 %v590_v58, 0.0 }
 0x105   : > { %v599_v63 = vmax.f32 %v591_v59, 0.0 }
 0x106   : > { %v848_v0 = vpack.c.bf16 %v598_v61, %v596_v60 }
 0x107   : > { %v846_v1 = vpack.c.bf16 %v599_v63, %v597_v62 }
 0x109   : > { %847 = vmatprep.subr.bf16.mxu1 %v846_v1 }
 0x10a   : > { %849 = vmatpush1.bf16.msra.mxu1 %v848_v0 }
 0x10d   : > { %831 = vmatmul.mubr.msk.f32.vlgmr.msra.gmra.mrb[8].mxu1 %vm603_vm1, %v600_v2 }
 0x1e0   : > { %v673_v4 = vpop.f32.mrb[8].mxu1 }
 0x1e1   : > { %v674_v5 = vadd.f32 %v673_v4, %v602_v3  ;;  %v675_v7 = vpop.f32.mrb[9].mxu1 }
 0x1e2   : > { %v676_v9 = vadd.f32 %v675_v7, %v602_v3 }
 0x1e3   : > { %v832_v10 = vmul.f32 -1.442695, %v674_v5 }
 0x1e4   : > { %v833_v11 = vmul.f32 -1.442695, %v676_v9 }
 0x1e5   : > { %917 = vpow2.f32 %v832_v10 }
 0x1e6   : > { %919 = vpow2.f32 %v833_v11 }
 0x1ef   : > { %v918_v12 = vpop.eup %917 }
 0x1f0   : > { %v920_v13 = vpop.eup %919  ;;  %v684_v14 = vadd.f32 1.0, %v918_v12 }
 0x1f1   : > { %v685_v15 = vadd.f32 1.0, %v920_v13 }
 0x1f2   : > { %921 = vrcp.f32 %v684_v14 }
 0x1f3   : > { %923 = vrcp.f32 %v685_v15 }
 0x1fc   : > { %v922_v19 = vpop.eup %921 }
 0x1fd   : > { %v924_v20 = vpop.eup %923  ;;  %v693_v21 = vrot.slane %v922_v19, %v692_v18 }
 0x1fe   : > { %v697_v22 = vrot.slane %v924_v20, %v692_v18 }
 0x1ff   : > { %v698_v23 = vmul.f32 %v693_v21, %v1128_v8 }
 0x200   : > { %v699_v24 = vmul.f32 %v697_v22, %v1126_v6 }
 0x201   : > { %700 = vst [vmem:[%s323_s6] sm:$0xff] %v698_v23 }
 0x202   : > { %701 = vst [vmem:[%s323_s6 + $0x8] sm:$0xff] %v699_v24 }
 0x203   : > { %938 = shalt.err (!%p935_p5)
}
 0x204   : > { %s939_s21 = scalar_lea.hbm %s1174_s17, 256  ;;  %s943_s24 = scalar_lea.hbm %s1228_s7, 512 }
 0x205   : > { %p940_p6 = scmp.ne.s32.totalorder %s1174_s17, %s939_s21  ;;  %p944_p10 = scmp.lt.u32.totalorder %s1174_s17, %s1228_s7 }
 0x206   : > { %p945_p11 = scmp.lt.u32.totalorder %s943_s24, %s939_s21  ;;  %p947_p13 = scmp.lt.u32.totalorder %s939_s21, %s1174_s17 }
 0x207   : > { %p941_p7 = pnand %p940_p6, %p1091_p4 }
 0x208   : > { %p946_p12 = por %p945_p11, %p944_p10 }
 0x209   : > { %p942_p9 = pneg %p941_p7 }
 0x20a   : > { %p948_p0 = por %p947_p13, %p946_p12 }
 0x20c   : > { %p949_p1 = pnand %p948_p0, %p942_p9 }
 0x20e   : > { %952 = shalt.err (!%p949_p1)
}
 0x20f   : > { %858 = dma.vmem_to_hbm [thread:$0]  (%p1091_p4), %s1176_s9, 256, %s1174_s17, %s703_s29  }
 0x210 PF: > { %p864_p2 = scmp.ge.s32.totalorder %s1003_s8, 2  ;;  %s731_s11 = sand.u32 1, %s983_s26  }
 0x211   : > { %s732_s13 = scalar_lea.sflag [#allocation4], %s731_s11 }
 0x212   : > { %p861_p3 = pnand %p864_p2, %p1098_p8 }
 0x214   : > { %978 = dma.done.wait (!%p861_p3), %s732_s13, 256  }
 0x215   : > { %980 = vsyncadd (!%p861_p3), %s732_s13, 4294967040  ;;  %s21_s8 = sadd.s32 1, %s1003_s8   ;;  %s1231_s26 = smov %s987_s27 }
 0x216   : > { %p18_p5 = scmp.ge.s32.totalorder %s21_s8, 4   ;;  %s1232_s27 = smov %s991_s28 }
 0x217   : > { %s1233_s28 = smov %s1104_s15  ;;  %s1234_s29 = smov %s999_s30 }
 0x218   : > { %s1235_s30 = smov %s1237_s10  ;;  %20 = sbr.rel (!%p18_p5) target bundleno = 6 (0x6), region = 86 }
 0x21f   :  { %737 = vsyncpa [#allocation4], 1 }
 0x220   :  { %739 = vsyncpa [#allocation4 + $0x1], 1 }

</bundles_post_ra>
